<compile_context>
chip_gen: v5e
topology: v5e:2x2
jax: 0.10.0
libtpu: 0.0.40
codegen_flags: <defaults>
</compile_context>

<pallas_src>
import functools

import jax
import jax.numpy as jnp
from jax.experimental import pallas as pl
from jax.experimental.pallas import tpu as pltpu


def _round_up(n, m):
    return ((n + m - 1) // m) * m


def mlp_kernel(x_ref, w1_ref, b1_ref, w2_ref, b2_ref, w3_ref, b3_ref, o_ref):
    # Linear(input_dim, width1) + ReLU   (all f32: kernel is memory-bound, MXU idle)
    h1 = jnp.dot(x_ref[...], w1_ref[...], preferred_element_type=jnp.float32)
    h1 = jnp.maximum(h1 + b1_ref[...], 0.0)
    # Linear(width1, width2) + ReLU
    h2 = jnp.dot(h1, w2_ref[...], preferred_element_type=jnp.float32)
    h2 = jnp.maximum(h2 + b2_ref[...], 0.0)
    # Linear(width2, output_dim)  (no activation, matches nn.Sequential)
    out = jnp.dot(h2, w3_ref[...], preferred_element_type=jnp.float32)
    o_ref[...] = (out + b3_ref[...]).astype(o_ref.dtype)


@functools.partial(jax.jit, static_argnames=("block_batch",))
def mlp_forward(x, w1, b1, w2, b2, w3, b3, *, block_batch=1024):
    batch, in_dim = x.shape
    width1 = w1.shape[1]
    width2 = w2.shape[1]
    out_dim = w3.shape[1]

    # Batch tile: big (amortizes ~0.35us/step overhead, better DMA sizes), but
    #  - never larger than the (sublane-rounded) batch,
    #  - capped at ~half the batch (16-aligned) so the grid has >=2 steps and
    #    v7x's two TensorCores can split the "parallel" batch axis.
    tb = min(block_batch,
             _round_up(pl.cdiv(batch, 2), 16),
             _round_up(batch, 8))
    tb = max(tb, 8)
    grid = (pl.cdiv(batch, tb),)
    # NOTE: when batch % tb != 0, the last block's out-of-range rows contain
    # garbage; they pass through the matmuls (no transcendentals, can't fault)
    # and their stores are dropped by Pallas. Do not add NaN-sensitive epilogues.

    flops = 2 * batch * (in_dim * width1 + width1 * width2 + width2 * out_dim)
    bytes_accessed = 4 * (x.size + w1.size + b1.size + w2.size + b2.size
                          + w3.size + b3.size + batch * out_dim)

    return pl.pallas_call(
        mlp_kernel,
        out_shape=jax.ShapeDtypeStruct((batch, out_dim), jnp.float32),
        grid=grid,
        in_specs=[
            pl.BlockSpec((tb, in_dim), lambda i: (i, 0)),      # x: tiled over batch
            pl.BlockSpec((in_dim, width1), lambda i: (0, 0)),  # weights/biases: resident
            pl.BlockSpec((1, width1), lambda i: (0, 0)),
            pl.BlockSpec((width1, width2), lambda i: (0, 0)),
            pl.BlockSpec((1, width2), lambda i: (0, 0)),
            pl.BlockSpec((width2, out_dim), lambda i: (0, 0)),
            pl.BlockSpec((1, out_dim), lambda i: (0, 0)),
        ],
        # Narrow (out_dim-wide) output block: masked stores, but ~16x less HBM
        # writeback than the previous 128-wide padded slab, and no wrapper slice.
        out_specs=pl.BlockSpec((tb, out_dim), lambda i: (i, 0)),
        compiler_params=pltpu.CompilerParams(
            dimension_semantics=("parallel",),   # megacore sharding on v7x
        ),
        cost_estimate=pl.CostEstimate(
            flops=flops, transcendentals=0, bytes_accessed=bytes_accessed),
    )(x, w1, b1, w2, b2, w3, b3)


def init_linear(key, fan_in, fan_out):
    """PyTorch nn.Linear default init: U(-1/sqrt(fan_in), 1/sqrt(fan_in)).

    Returned weight is already transposed to (fan_in, fan_out)."""
    kw, kb = jax.random.split(key)
    bound = 1.0 / jnp.sqrt(jnp.float32(fan_in))
    w = jax.random.uniform(kw, (fan_in, fan_out), jnp.float32, -bound, bound)
    b = jax.random.uniform(kb, (1, fan_out), jnp.float32, -bound, bound)
    return w, b


def _reference(x, w1, b1, w2, b2, w3, b3):
    ref = jnp.maximum(x @ w1 + b1, 0.0)
    ref = jnp.maximum(ref @ w2 + b2, 0.0)
    return ref @ w3 + b3


if __name__ == "__main__":
    # MLP(input_dim=32, width1=64, width2=32, output_dim=8)
    input_dim, width1, width2, output_dim = 32, 64, 32, 8

    key = jax.random.PRNGKey(0)
    kx, k1, k2, k3, kx2 = jax.random.split(key, 5)

    w1, b1 = init_linear(k1, input_dim, width1)
    w2, b2 = init_linear(k2, width1, width2)
    w3, b3 = init_linear(k3, width2, output_dim)

    # Small-batch check (single grid step, block == full batch).
    x = jax.random.normal(kx, (8, input_dim), jnp.float32)
    out = mlp_forward(x, w1, b1, w2, b2, w3, b3)
    jax.block_until_ready(out)
    ref = _reference(x, w1, b1, w2, b2, w3, b3)
    assert out.shape == (8, output_dim)
    assert jnp.allclose(out, ref, atol=2e-3, rtol=2e-3), float(jnp.max(jnp.abs(out - ref)))

    # Non-tile-multiple batch: exercises the multi-step batch grid (tb=160,
    # grid=2) and the Pallas-handled partial last block.
    x2 = jax.random.normal(kx2, (300, input_dim), jnp.float32)
    out2 = mlp_forward(x2, w1, b1, w2, b2, w3, b3)
    jax.block_until_ready(out2)
    ref2 = _reference(x2, w1, b1, w2, b2, w3, b3)
    assert out2.shape == (300, output_dim)
    assert jnp.allclose(out2, ref2, atol=2e-3, rtol=2e-3), float(jnp.max(jnp.abs(out2 - ref2)))

    print("KERNEL_OK")
</pallas_src>

<mosaic_0001>
module attributes {stable_mosaic.version = 11 : i64} {
  func.func @mlp_kernel(%arg0: i32, %arg1: memref<8x32xf32, #tpu.memory_space<vmem>>, %arg2: memref<32x64xf32, #tpu.memory_space<vmem>>, %arg3: memref<1x64xf32, #tpu.memory_space<vmem>>, %arg4: memref<64x32xf32, #tpu.memory_space<vmem>>, %arg5: memref<1x32xf32, #tpu.memory_space<vmem>>, %arg6: memref<32x8xf32, #tpu.memory_space<vmem>>, %arg7: memref<1x8xf32, #tpu.memory_space<vmem>>, %arg8: memref<8x8xf32, #tpu.memory_space<vmem>>) attributes {dimension_semantics = [#tpu.dimension_semantics<parallel>], iteration_bounds = array<i64: 1>, scalar_prefetch = 0 : i64, scratch_operands = 0 : i64, tpu.core_type = #tpu.core_type<tc>, window_params = [{transform_indices = @transform_0, window_bounds = array<i64: 8, 32>}, {pipeline_mode = #tpu.pipeline_mode<synchronous>, transform_indices = @transform_1, window_bounds = array<i64: 32, 64>}, {pipeline_mode = #tpu.pipeline_mode<synchronous>, transform_indices = @transform_2, window_bounds = array<i64: 1, 64>}, {pipeline_mode = #tpu.pipeline_mode<synchronous>, transform_indices = @transform_3, window_bounds = array<i64: 64, 32>}, {pipeline_mode = #tpu.pipeline_mode<synchronous>, transform_indices = @transform_4, window_bounds = array<i64: 1, 32>}, {pipeline_mode = #tpu.pipeline_mode<synchronous>, transform_indices = @transform_5, window_bounds = array<i64: 32, 8>}, {pipeline_mode = #tpu.pipeline_mode<synchronous>, transform_indices = @transform_6, window_bounds = array<i64: 1, 8>}, {transform_indices = @transform_7, window_bounds = array<i64: 8, 8>}]} {
    %c0 = arith.constant 0 : index
    %c0_0 = arith.constant 0 : index
    %0 = vector.load %arg1[%c0, %c0_0] : memref<8x32xf32, #tpu.memory_space<vmem>>, vector<8x32xf32>
    %c0_1 = arith.constant 0 : index
    %c0_2 = arith.constant 0 : index
    %1 = vector.load %arg2[%c0_1, %c0_2] : memref<32x64xf32, #tpu.memory_space<vmem>>, vector<32x64xf32>
    %cst = arith.constant dense<0.000000e+00> : vector<8x64xf32>
    %2 = tpu.matmul %0, %1, %cst {dimension_numbers = #tpu.dot_dimension_numbers<[1], [0], [0], [1], [0, 0, 1, 1], [], []>} : vector<8x32xf32>, vector<32x64xf32>, vector<8x64xf32> -> vector<8x64xf32>
    %c0_3 = arith.constant 0 : index
    %c0_4 = arith.constant 0 : index
    %3 = vector.load %arg3[%c0_3, %c0_4] : memref<1x64xf32, #tpu.memory_space<vmem>>, vector<1x64xf32>
    %4 = vector.broadcast %3 : vector<1x64xf32> to vector<8x64xf32>
    %5 = arith.addf %2, %4 : vector<8x64xf32>
    %cst_5 = arith.constant 0.000000e+00 : f32
    %6 = vector.broadcast %cst_5 : f32 to vector<8x64xf32>
    %7 = arith.maximumf %5, %6 : vector<8x64xf32>
    %c0_6 = arith.constant 0 : index
    %c0_7 = arith.constant 0 : index
    %8 = vector.load %arg4[%c0_6, %c0_7] : memref<64x32xf32, #tpu.memory_space<vmem>>, vector<64x32xf32>
    %cst_8 = arith.constant dense<0.000000e+00> : vector<8x32xf32>
    %9 = tpu.matmul %7, %8, %cst_8 {dimension_numbers = #tpu.dot_dimension_numbers<[1], [0], [0], [1], [0, 0, 1, 1], [], []>} : vector<8x64xf32>, vector<64x32xf32>, vector<8x32xf32> -> vector<8x32xf32>
    %c0_9 = arith.constant 0 : index
    %c0_10 = arith.constant 0 : index
    %10 = vector.load %arg5[%c0_9, %c0_10] : memref<1x32xf32, #tpu.memory_space<vmem>>, vector<1x32xf32>
    %11 = vector.broadcast %10 : vector<1x32xf32> to vector<8x32xf32>
    %12 = arith.addf %9, %11 : vector<8x32xf32>
    %cst_11 = arith.constant 0.000000e+00 : f32
    %13 = vector.broadcast %cst_11 : f32 to vector<8x32xf32>
    %14 = arith.maximumf %12, %13 : vector<8x32xf32>
    %c0_12 = arith.constant 0 : index
    %c0_13 = arith.constant 0 : index
    %15 = vector.load %arg6[%c0_12, %c0_13] : memref<32x8xf32, #tpu.memory_space<vmem>>, vector<32x8xf32>
    %cst_14 = arith.constant dense<0.000000e+00> : vector<8x8xf32>
    %16 = tpu.matmul %14, %15, %cst_14 {dimension_numbers = #tpu.dot_dimension_numbers<[1], [0], [0], [1], [0, 0, 1, 1], [], []>} : vector<8x32xf32>, vector<32x8xf32>, vector<8x8xf32> -> vector<8x8xf32>
    %c0_15 = arith.constant 0 : index
    %c0_16 = arith.constant 0 : index
    %17 = vector.load %arg7[%c0_15, %c0_16] : memref<1x8xf32, #tpu.memory_space<vmem>>, vector<1x8xf32>
    %18 = vector.broadcast %17 : vector<1x8xf32> to vector<8x8xf32>
    %19 = arith.addf %16, %18 : vector<8x8xf32>
    %c0_17 = arith.constant 0 : index
    %c0_18 = arith.constant 0 : index
    %20 = vector.load %arg8[%c0_17, %c0_18] : memref<8x8xf32, #tpu.memory_space<vmem>>, vector<8x8xf32>
    tpu.vector_store %arg8[%c0_17, %c0_18], %19 {strides = array<i32>} : memref<8x8xf32, #tpu.memory_space<vmem>>, vector<8x8xf32>,
    return
  }
  func.func @transform_0(%arg0: i32) -> (i32, i32) {
    %c0_i32 = arith.constant 0 : i32
    %c0_i32_0 = arith.constant 0 : i32
    return %arg0, %c0_i32 : i32, i32
  }
  func.func @transform_1(%arg0: i32) -> (i32, i32) {
    %c0_i32 = arith.constant 0 : i32
    %c0_i32_0 = arith.constant 0 : i32
    %c0_i32_1 = arith.constant 0 : i32
    return %c0_i32, %c0_i32_0 : i32, i32
  }
  func.func @transform_2(%arg0: i32) -> (i32, i32) {
    %c0_i32 = arith.constant 0 : i32
    %c0_i32_0 = arith.constant 0 : i32
    %c0_i32_1 = arith.constant 0 : i32
    return %c0_i32, %c0_i32_0 : i32, i32
  }
  func.func @transform_3(%arg0: i32) -> (i32, i32) {
    %c0_i32 = arith.constant 0 : i32
    %c0_i32_0 = arith.constant 0 : i32
    %c0_i32_1 = arith.constant 0 : i32
    return %c0_i32, %c0_i32_0 : i32, i32
  }
  func.func @transform_4(%arg0: i32) -> (i32, i32) {
    %c0_i32 = arith.constant 0 : i32
    %c0_i32_0 = arith.constant 0 : i32
    %c0_i32_1 = arith.constant 0 : i32
    return %c0_i32, %c0_i32_0 : i32, i32
  }
  func.func @transform_5(%arg0: i32) -> (i32, i32) {
    %c0_i32 = arith.constant 0 : i32
    %c0_i32_0 = arith.constant 0 : i32
    %c0_i32_1 = arith.constant 0 : i32
    return %c0_i32, %c0_i32_0 : i32, i32
  }
  func.func @transform_6(%arg0: i32) -> (i32, i32) {
    %c0_i32 = arith.constant 0 : i32
    %c0_i32_0 = arith.constant 0 : i32
    %c0_i32_1 = arith.constant 0 : i32
    return %c0_i32, %c0_i32_0 : i32, i32
  }
  func.func @transform_7(%arg0: i32) -> (i32, i32) {
    %c0_i32 = arith.constant 0 : i32
    %c0_i32_0 = arith.constant 0 : i32
    return %arg0, %c0_i32 : i32, i32
  }
}

</mosaic_0001>

<bundles_post_ra>
// kernel: mlp_forward.1
= control target key start
LH: loop header
LB: loop body
LE: loop exit
PB: predicated region body
PF: predicated region fallthrough
CT: control target
= control target key end

     0   :  { %s286_s0 = inlined_call_operand.vmem [shape: f32[8,32], index: 0, kind: input, shape index: {}]   ;;  %s287_s1 = inlined_call_operand.vmem [shape: f32[32,64], index: 1, kind: input, shape index: {}]   ;;  %s288_s2 = inlined_call_operand.vmem [shape: f32[1,64], index: 2, kind: input, shape index: {}]   ;;  %s289_s3 = inlined_call_operand.vmem [shape: f32[64,32], index: 3, kind: input, shape index: {}]   ;;  %s290_s4 = inlined_call_operand.vmem [shape: f32[1,32], index: 4, kind: input, shape index: {}]   ;;  %s291_s5 = inlined_call_operand.vmem [shape: f32[32,8], index: 5, kind: input, shape index: {}]   ;;  %s292_s6 = inlined_call_operand.vmem [shape: f32[1,8], index: 6, kind: input, shape index: {}]   ;;  %s293_s7 = inlined_call_operand.hbm [shape: f32[8,8], index: 7, kind: output, shape index: {}]  }
   0x1   :  { %v31_v0 = vld [vmem:[%s287_s1 + $0x18] sm:$0xff]  ;;  %v30_v1 = vld [vmem:[%s287_s1 + $0x10] sm:$0xff]  ;;  %v29_v3 = vld [vmem:[%s287_s1 + $0x8] sm:$0xff] }
   0x2   :  { %52 = vmatpush.msra.mxu0 %v31_v0  ;;  %v68_v2 = vld [vmem:[%s289_s3 + $0x38] sm:$0xff]  ;;  %v67_v4 = vld [vmem:[%s289_s3 + $0x30] sm:$0xff]  ;;  %v28_v5 = vld [vmem:[%s287_s1] sm:$0xff] }
   0x3   :  { %85 = vmatpush.msra.mxu1 %v68_v2  ;;  %v66_v6 = vld [vmem:[%s289_s3 + $0x28] sm:$0xff] }
   0x4   :  { %53 = vmatpush.msra.mxu0 %v30_v1 }
   0x5   :  { %86 = vmatpush.msra.mxu1 %v67_v4 }
   0x6   :  { %12 = vsyncpa [#allocation3], 0  ;;  %54 = vmatpush.msra.mxu0 %v29_v3  ;;  %v27_v7 = vld [vmem:[%s286_s0] sm:$0xff]  ;;  %vm36_vm0 = vcmask 261120   ;;  %v64_v9 = vld [vmem:[%s289_s3 + $0x18] sm:$0xff]  ;;  %vm73_vm1 = vcmask 523264  }
   0x7   :  { %v65_v8 = vld [vmem:[%s289_s3 + $0x20] sm:$0xff]  ;;  %87 = vmatpush.msra.mxu1 %v66_v6  ;;  %v63_v10 = vld [vmem:[%s289_s3 + $0x10] sm:$0xff]  ;;  %v62_v11 = vld [vmem:[%s289_s3 + $0x8] sm:$0xff]  ;;  %s180_s14 = smov [#allocation2]   ;;  %vm129_vm2 = vcmask 64512  }
   0x8   :  { %55 = vmatpush.msra.mxu0 %v28_v5  ;;  %v61_v12 = vld [vmem:[%s289_s3] sm:$0xff]  ;;  %v101_v13 = vld [vmem:[%s291_s5 + $0x18] sm:$0xff]  ;;  %v100_v18 = vld [vmem:[%s291_s5 + $0x10] sm:$0xff]  ;;  %s136_s15 = sshll.u32 %s180_s14, 4  ;;  %s137_s15 = int_to_ptr.vmem [resolvable:$true] %s136_s15 }
   0x9   :  { %147 = vmatmul.msk.f32.vlgmr.msra.gmra.mxu0 %vm36_vm0, %v27_v7  ;;  %88 = vmatpush.msra.mxu1 %v65_v8  ;;  %v151_v14 = vld [vmem:[%s288_s2] ss:$0 sm:$0xff]  ;;  %v99_v19 = vld [vmem:[%s291_s5 + $0x8] sm:$0xff] }
   0xa   :  { %121 = vmatpush.msra.mxu2 %v101_v13  ;;  %v98_v20 = vld [vmem:[%s291_s5] sm:$0xff]  ;;  %s138_s5 = sshll.u32 %s293_s7, 4  ;;  %s139_s5 = int_to_ptr.hbm [resolvable:$true] %s138_s5 }
   0xb   :  { %89 = vmatpush.msra.mxu1 %v64_v9  ;;  %v152_v21 = vld [vmem:[%s290_s4] ss:$0 sm:$0xff] }
   0xc   :  { %122 = vmatpush.msra.mxu2 %v100_v18  ;;  %v153_v25 = vld [vmem:[%s292_s6] ss:$0 sm:$0xff] }
   0xd   :  { %90 = vmatpush.msra.mxu1 %v63_v10 }
   0xe   :  { %123 = vmatpush.msra.mxu2 %v99_v19 }
   0xf   :  { %91 = vmatpush.msra.mxu1 %v62_v11 }
  0x10   :  { %124 = vmatpush.msra.mxu2 %v98_v20 }
  0x11   :  { %92 = vmatpush.msra.mxu1 %v61_v12 }
  0x86   :  { %v57_v15 = vpop.f32.mrf.mxu0 }
  0x87   :  { %v58_v16 = vadd.f32 %v151_v14, %v57_v15 }
  0x89   :  { %v60_v17 = vmax.f32 %v58_v16, 0.0 }
  0x8b   :  { %148 = vmatmul.msk.f32.vlgmr.msra.gmra.mxu1 %vm73_vm1, %v60_v17 }
 0x108   :  { %v94_v22 = vpop.f32.mrf.mxu1 }
 0x109   :  { %v95_v23 = vadd.f32 %v152_v21, %v94_v22 }
 0x10b   :  { %v97_v24 = vmax.f32 %v95_v23, 0.0 }
 0x10d   :  { %149 = vmatmul.msk.f32.vlgmr.msra.gmra.mxu2 %vm36_vm0, %v97_v24 }
 0x190   :  { %v126_v26 = vpop.f32.mrf.mxu2 }
 0x191   :  { %v127_v27 = vadd.f32 %v153_v25, %v126_v26 }
 0x193   :  { %130 = vst.msk [vmem:[#allocation2] sm:$0xff] %vm129_vm2, %v127_v27 }
 0x194   :  { %141 = dma.vmem_to_hbm [thread:$0]  %s137_s15, 128, %s139_s5, [#allocation3]  }
 0x195   :  { %178 = dma.done.wait [#allocation3], 128  }
 0x196   :  { %179 = vsyncadd [#allocation3], 4294967168 }
 0x197   :  { %146 = vsyncpa [#allocation3], 1 }

</bundles_post_ra>
